<compile_context>
chip_gen: v7x
topology: tpu7x:2x2x1
jax: 0.10.0
libtpu: 0.0.40
codegen_flags: <defaults>
</compile_context>

<pallas_src>
import jax
import jax.numpy as jnp
import numpy as np
from jax.experimental import pallas as pl
from jax.experimental.pallas import tpu as pltpu


def _se_var3_kernel(x_ref, w_ref, b_ref, o_ref):
    # x_ref: (NB, C, HW)   w_ref: (C, C) already transposed to (Cin, Cout)
    # b_ref: (1, C)        o_ref: (NB, C, HW)
    x = x_ref[...].astype(jnp.float32)                       # (NB, C, HW)
    hw = x.shape[-1]

    # ---- global average pool (lane reduction over HW) ---------------------
    s = jnp.sum(x, axis=-1) * (1.0 / hw)                     # (NB, C)

    # ---- 1x1 conv with bias: y[n, co] = sum_ci s[n, ci] * W[co, ci] + b ---
    y = jnp.dot(s, w_ref[...].astype(jnp.float32),
                preferred_element_type=jnp.float32)          # (NB, C)
    y = y + b_ref[...]                                       # (1, C) broadcast

    # ---- gate: x * y, broadcast over the HW (lane) axis --------------------
    o_ref[...] = (x * y[:, :, None]).astype(o_ref.dtype)


def se_var3(x_nchw, w_oihw, bias, *, batch_tile=None):
    """x_nchw: (N, C, H, W). w_oihw: (C, C, 1, 1) conv1x1 weight. bias: (C,)."""
    N, C, H, W = x_nchw.shape
    HW = H * W
    if batch_tile is None:
        batch_tile = N                       # whole batch in one grid step

    # lane-dense working layout: spatial on lanes, channels on sublanes
    x3 = x_nchw.reshape(N, C, HW)
    w_t = w_oihw.reshape(C, C).T             # (Cin, Cout), transposed host-side
    b2 = bias.reshape(1, C)

    grid = (pl.cdiv(N, batch_tile),)

    out = pl.pallas_call(
        _se_var3_kernel,
        out_shape=jax.ShapeDtypeStruct((N, C, HW), x_nchw.dtype),
        grid_spec=pltpu.PrefetchScalarGridSpec(
            num_scalar_prefetch=0,
            grid=grid,
            in_specs=[
                pl.BlockSpec((batch_tile, C, HW), lambda n: (n, 0, 0)),
                pl.BlockSpec((C, C), lambda n: (0, 0)),      # VMEM-resident weight
                pl.BlockSpec((1, C), lambda n: (0, 0)),      # VMEM-resident bias
            ],
            out_specs=pl.BlockSpec((batch_tile, C, HW), lambda n: (n, 0, 0)),
        ),
        compiler_params=pltpu.CompilerParams(
            dimension_semantics=("parallel",)),
    )(x3, w_t, b2)

    return out.reshape(N, C, H, W)


# ---------------------------- reference (pure JAX) ---------------------------
def ref_se_var3(x, w_oihw, bias):
    s = jnp.mean(x, axis=(2, 3), keepdims=True)              # (N, C, 1, 1)
    y = jax.lax.conv_general_dilated(
        s, w_oihw, window_strides=(1, 1), padding="VALID",
        dimension_numbers=("NCHW", "OIHW", "NCHW"))
    y = y + bias.reshape(1, -1, 1, 1)
    return x * y


if __name__ == "__main__":
    N, C, H, W = 2, 4, 16, 16

    key = jax.random.PRNGKey(0)
    k1, k2, k3 = jax.random.split(key, 3)

    x = jax.random.normal(k1, (N, C, H, W), jnp.float32)          # NCHW input
    w = 0.1 * jax.random.normal(k2, (C, C, 1, 1), jnp.float32)    # conv1x1 weight
    b = 0.05 * jax.random.normal(k3, (C,), jnp.float32)           # conv1x1 bias

    out = se_var3(x, w, b)
    out = jax.block_until_ready(out)

    ref = ref_se_var3(x, w, b)
    np.testing.assert_allclose(np.asarray(out), np.asarray(ref),
                               rtol=1e-5, atol=1e-5)

    print("KERNEL_OK")
</pallas_src>

<mosaic_0001>
module attributes {stable_mosaic.version = 11 : i64} {
  func.func @_se_var3_kernel(%arg0: i32, %arg1: memref<2x4x256xf32, #tpu.memory_space<vmem>>, %arg2: memref<4x4xf32, #tpu.memory_space<vmem>>, %arg3: memref<1x4xf32, #tpu.memory_space<vmem>>, %arg4: memref<2x4x256xf32, #tpu.memory_space<vmem>>) attributes {dimension_semantics = [#tpu.dimension_semantics<parallel>], iteration_bounds = array<i64: 1>, scalar_prefetch = 0 : i64, scratch_operands = 0 : i64, tpu.core_type = #tpu.core_type<tc>, window_params = [{transform_indices = @transform_0, window_bounds = array<i64: 2, 4, 256>}, {pipeline_mode = #tpu.pipeline_mode<synchronous>, transform_indices = @transform_1, window_bounds = array<i64: 4, 4>}, {pipeline_mode = #tpu.pipeline_mode<synchronous>, transform_indices = @transform_2, window_bounds = array<i64: 1, 4>}, {transform_indices = @transform_3, window_bounds = array<i64: 2, 4, 256>}]} {
    %c0 = arith.constant 0 : index
    %c0_0 = arith.constant 0 : index
    %c0_1 = arith.constant 0 : index
    %0 = vector.load %arg1[%c0, %c0_0, %c0_1] : memref<2x4x256xf32, #tpu.memory_space<vmem>>, vector<2x4x256xf32>
    %cst = arith.constant dense<0.000000e+00> : vector<2x4xf32>
    %1 = vector.multi_reduction <add>, %0, %cst [2] : vector<2x4x256xf32> to vector<2x4xf32>
    %cst_2 = arith.constant 3.906250e-03 : f32
    %2 = vector.broadcast %cst_2 : f32 to vector<2x4xf32>
    %3 = arith.mulf %1, %2 : vector<2x4xf32>
    %c0_3 = arith.constant 0 : index
    %c0_4 = arith.constant 0 : index
    %4 = vector.load %arg2[%c0_3, %c0_4] : memref<4x4xf32, #tpu.memory_space<vmem>>, vector<4x4xf32>
    %cst_5 = arith.constant dense<0.000000e+00> : vector<2x4xf32>
    %5 = tpu.matmul %3, %4, %cst_5 {dimension_numbers = #tpu.dot_dimension_numbers<[1], [0], [0], [1], [0, 0, 1, 1], [], []>} : vector<2x4xf32>, vector<4x4xf32>, vector<2x4xf32> -> vector<2x4xf32>
    %c0_6 = arith.constant 0 : index
    %c0_7 = arith.constant 0 : index
    %6 = vector.load %arg3[%c0_6, %c0_7] : memref<1x4xf32, #tpu.memory_space<vmem>>, vector<1x4xf32>
    %7 = vector.broadcast %6 : vector<1x4xf32> to vector<2x4xf32>
    %8 = arith.addf %5, %7 : vector<2x4xf32>
    %9 = vector.shape_cast %8 : vector<2x4xf32> to vector<2x4x1xf32>
    %10 = vector.broadcast %9 : vector<2x4x1xf32> to vector<2x4x256xf32>
    %11 = arith.mulf %0, %10 : vector<2x4x256xf32>
    %c0_8 = arith.constant 0 : index
    %c0_9 = arith.constant 0 : index
    %c0_10 = arith.constant 0 : index
    %12 = vector.load %arg4[%c0_8, %c0_9, %c0_10] : memref<2x4x256xf32, #tpu.memory_space<vmem>>, vector<2x4x256xf32>
    tpu.vector_store %arg4[%c0_8, %c0_9, %c0_10], %11 {strides = array<i32>} : memref<2x4x256xf32, #tpu.memory_space<vmem>>, vector<2x4x256xf32>,
    return
  }
  func.func @transform_0(%arg0: i32) -> (i32, i32, i32) {
    %c0_i32 = arith.constant 0 : i32
    %c0_i32_0 = arith.constant 0 : i32
    %c0_i32_1 = arith.constant 0 : i32
    return %arg0, %c0_i32, %c0_i32_0 : i32, i32, i32
  }
  func.func @transform_1(%arg0: i32) -> (i32, i32) {
    %c0_i32 = arith.constant 0 : i32
    %c0_i32_0 = arith.constant 0 : i32
    %c0_i32_1 = arith.constant 0 : i32
    return %c0_i32, %c0_i32_0 : i32, i32
  }
  func.func @transform_2(%arg0: i32) -> (i32, i32) {
    %c0_i32 = arith.constant 0 : i32
    %c0_i32_0 = arith.constant 0 : i32
    %c0_i32_1 = arith.constant 0 : i32
    return %c0_i32, %c0_i32_0 : i32, i32
  }
  func.func @transform_3(%arg0: i32) -> (i32, i32, i32) {
    %c0_i32 = arith.constant 0 : i32
    %c0_i32_0 = arith.constant 0 : i32
    %c0_i32_1 = arith.constant 0 : i32
    return %arg0, %c0_i32, %c0_i32_0 : i32, i32, i32
  }
}

</mosaic_0001>

<bundles_post_ra>
// kernel: tpu_custom_call.1
= control target key start
LH: loop header
LB: loop body
LE: loop exit
PB: predicated region body
PF: predicated region fallthrough
CT: control target
= control target key end

     0   :  { %8 = vsyncpa [#allocation3], 0  ;;  %s384_s0 = inlined_call_operand.hbm [shape: f32[2,4,256], index: 0, kind: input, shape index: {}]   ;;  %s385_s1 = inlined_call_operand.hbm [shape: f32[4,4], index: 1, kind: input, shape index: {}]   ;;  %s386_s2 = inlined_call_operand.vmem [shape: f32[1,4], index: 2, kind: input, shape index: {}]   ;;  %s387_s3 = inlined_call_operand.hbm [shape: f32[2,4,256], index: 3, kind: output, shape index: {}]  }
   0x1   :  { %9 = vsyncpa [#allocation6], 0 }
   0x2   :  { %10 = vsyncpa [#allocation4], 0  ;;  %s306_s12 = smov [#allocation2]   ;;  %s234_s16 = scalar_lea.hbm %s384_s0, 256 }
   0x3   :  { %s16_s13 = sshll.u32 %s306_s12, 4  ;;  %p235_p0 = scmp.ne.s32.totalorder %s384_s0, %s234_s16  ;;  %s17_s13 = int_to_ptr.vmem [resolvable:$true] %s16_s13 }
   0x4   :  { %p238_p1 = scmp.lt.u32.totalorder %s234_s16, %s384_s0 }
   0x6   :  { %p240_p2 = pnand %p238_p1, %p235_p0 }
   0x8   :  { %243 = shalt.err (!%p240_p2)
}
   0x9   :  { %s244_s21 = scalar_lea.vmem %s17_s13, 256  ;;  %p249_p4 = scmp.lt.s32.totalorder %s17_s13, %s17_s13 }
   0xa   :  { %p245_p3 = scmp.ne.s32.totalorder %s17_s13, %s244_s21  ;;  %p250_p5 = scmp.lt.s32.totalorder %s244_s21, %s244_s21 }
   0xc   :  { %p251_p6 = por %p250_p5, %p249_p4 }
   0xe   :  { %p252_p7 = pnand %p251_p6, %p245_p3 }
  0x10   :  { %255 = shalt.err (!%p252_p7)
}
  0x11   :  { %s307_s22 = smov 128   ;;  %s308_s23 = smov 8  }
  0x12   :  { %22 = dma.hbm_to_vmem [thread:$0]  %s384_s0, 256, %s17_s13, [#allocation3], %s307_s22, %s307_s22, %s308_s23  }
  0x13   :  { %s309_s26 = smov [#allocation5]   ;;  %s256_s30 = scalar_lea.hbm %s385_s1, 64 }
  0x14   :  { %s29_s27 = sshll.u32 %s309_s26, 4  ;;  %p257_p8 = scmp.ne.s32.totalorder %s385_s1, %s256_s30  ;;  %s30_s27 = int_to_ptr.vmem [resolvable:$true] %s29_s27 }
  0x15   :  { %p260_p9 = scmp.lt.u32.totalorder %s256_s30, %s385_s1 }
  0x17   :  { %p262_p10 = pnand %p260_p9, %p257_p8 }
  0x19   :  { %265 = shalt.err (!%p262_p10)
}
  0x1a   :  { %s266_s8 = scalar_lea.vmem %s30_s27, 64  ;;  %p271_p12 = scmp.lt.s32.totalorder %s30_s27, %s30_s27 }
  0x1b   :  { %p267_p11 = scmp.ne.s32.totalorder %s30_s27, %s266_s8  ;;  %p272_p13 = scmp.lt.s32.totalorder %s266_s8, %s266_s8 }
  0x1d   :  { %p273_p0 = por %p272_p13, %p271_p12 }
  0x1f   :  { %p274_p1 = pnand %p273_p0, %p267_p11 }
  0x21   :  { %277 = shalt.err (!%p274_p1)
}
  0x22   :  { %32 = dma.hbm_to_vmem [thread:$0]  %s385_s1, 64, %s30_s27, [#allocation6]  }
  0x23   :  { %300 = dma.done.wait [#allocation3], 256  }
  0x24   :  { %301 = vsyncadd [#allocation3], 4294967040 }
  0x25   :  { %302 = dma.done.wait [#allocation6], 64  }
  0x26   :  { %303 = vsyncadd [#allocation6], 4294967232  ;;  %vm49_vm0 = vcmask 1043456   ;;  %v41_v0 = vld [vmem:[#allocation2] sm:$0xff]  ;;  %v42_v1 = vld [vmem:[#allocation2 + $0x8] sm:$0xff]  ;;  %v310_v11 = vmov 0.0   ;;  %v72_v12 = vlaneseq }
  0x27   :  { %v45_v2 = vcombine.high %v41_v0, %v41_v0  ;;  %v50_v3 = vsel %vm49_vm0, %v41_v0, 0.0  ;;  %v46_v4 = vcombine.high %v42_v1, %v42_v1  ;;  %v55_v6 = vsel %vm49_vm0, %v42_v1, 0.0  ;;  %v62_v10 = vld [vmem:[#allocation5] sm:$0xf]  ;;  %219 = vmatprep.subr.mxu0 %v310_v11  ;;  %v214_v23 = vld [vmem:[%s386_s2] ss:$0 sm:$0xff] }
  0x28   :  { %vm311_vm1 = vmmov 0   ;;  %220 = vmatpush3.msk.msra.mxu0 %vm49_vm0, %v62_v10  ;;  %v73_v13 = vand.u32 127, %v72_v12  ;;  %v75_v14 = vshrl.u32 %v72_v12, 7  ;;  %vm82_vm2 = vcmask 1041409   ;;  %s313_s11 = smov [#allocation7]  }
  0x29   :  { %v51_v5 = vsel %vm49_vm0, %v45_v2, 0.0  ;;  %v56_v7 = vsel %vm49_vm0, %v46_v4, 0.0  ;;  %221 = vmatprep.mubr.msk.f32.mxu0 %vm311_vm1, %v310_v11  ;;  %vm84_vm3 = vcmask 31744   ;;  %v312_v31 = vmov 839922192   ;;  %s201_s12 = sshll.u32 %s313_s11, 4  ;;  %s202_s12 = int_to_ptr.vmem [resolvable:$true] %s201_s12 }
  0x2a   :  { %v52_v8 = vadd.f32 %v51_v5, %v50_v3  ;;  %v57_v9 = vadd.f32 %v56_v7, %v55_v6  ;;  %v76_v16 = vsub.s32 %v73_v13, %v75_v14  ;;  %v162_v24 = vsub.s32 0, %v75_v14  ;;  %s278_s2 = scalar_lea.vmem %s202_s12, 256  ;;  %p283_p3 = scmp.lt.s32.totalorder %s202_s12, %s202_s12 }
  0x2b   :  { %v169_v29 = vsub.s32 1, %v75_v14  ;;  %v177_v32 = vunpack.c.l.s4 %v312_v31  ;;  %p279_p2 = scmp.ne.s32.totalorder %s202_s12, %s278_s2  ;;  %p284_p4 = scmp.lt.s32.totalorder %s278_s2, %s278_s2 }
  0x2c   :  { %53 = vadd.xlane.f32.xlu0 %v52_v8 }
  0x2d   :  { %v178_v33 = vunpack.c.0.s8 %v177_v32  ;;  %p285_p5 = por %p284_p4, %p283_p3 }
  0x2f   :  { %v181_v34 = vsub.s32 %v178_v33, %v75_v14  ;;  %p286_p6 = pnand %p285_p5, %p279_p2 }
  0x30   :  { %58 = vadd.xlane.f32.xlu0 %v57_v9 }
  0xb9   :  { %v54_v15 = vpop.xlane.xlu0 %53 }
  0xba   :  { %v60_v17 = vmul.f32 0.00390625, %v54_v15 }
  0xbc   :  { %v77_v20 = vrot.slane %v60_v17, %v76_v16 }
  0xbd   :  { %v59_v18 = vpop.xlane.xlu0 %58 }
  0xbe   :  { %v61_v19 = vmul.f32 0.00390625, %v59_v18 }
  0xc0   :  { %v81_v21 = vrot.slane %v61_v19, %v76_v16 }
  0xc2   :  { %v83_v22 = vsel %vm82_vm2, %v81_v21, %v77_v20 }
  0xc3   :  { %222 = vmatmul.mubr.msk.f32.vlgmr.msra.gmra.mrb[0].mxu0 %vm84_vm3, %v83_v22 }
 0x196   :  { %v156_v25 = vpop.f32.mrb[0].mxu0 }
 0x197   :  { %v157_v26 = vadd.f32 %v214_v23, %v156_v25  ;;  %v223_v27 = vpop.f32.mrb[1].mxu0 }
 0x199   :  { %v163_v28 = vrot.slane %v157_v26, %v162_v24  ;;  %v170_v30 = vrot.slane %v157_v26, %v169_v29 }
 0x19b   :  { %165 = vbcast.lane.b32.xlu1 %v163_v28, 256 }
 0x19f   :  { %172 = vbcast.lane.b32.xlu1 %v170_v30, 256 }
 0x20d   :  { %v166_v35 = vpop.permute.xlu1 %165 }
 0x20e   :  { %v182_v36 = vrot.slane %v166_v35, %v181_v34 }
 0x210   :  { %v192_v37 = vmul.f32 %v182_v36, %v41_v0 }
 0x211   :  { %v173_v38 = vpop.permute.xlu1 %172 }
 0x212   :  { %194 = vst [vmem:[#allocation7] sm:$0xff] %v192_v37  ;;  %v189_v39 = vrot.slane %v173_v38, %v181_v34 }
 0x214   :  { %v193_v40 = vmul.f32 %v189_v39, %v42_v1 }
 0x216   :  { %195 = vst [vmem:[#allocation7 + $0x8] sm:$0xff] %v193_v40 }
 0x217   :  { %289 = shalt.err (!%p286_p6)
}
 0x218   :  { %s290_s15 = scalar_lea.hbm %s387_s3, 256 }
 0x219   :  { %p291_p7 = scmp.ne.s32.totalorder %s387_s3, %s290_s15  ;;  %p294_p8 = scmp.lt.u32.totalorder %s290_s15, %s387_s3 }
 0x21b   :  { %p296_p9 = pnand %p294_p8, %p291_p7 }
 0x21d   :  { %299 = shalt.err (!%p296_p9)
}
 0x21e   :  { %207 = dma.vmem_to_hbm [thread:$0]  %s202_s12, 256, %s387_s3, [#allocation4], %s307_s22, %s307_s22, %s308_s23  }
 0x21f   :  { %304 = dma.done.wait [#allocation4], 256  }
 0x220   :  { %305 = vsyncadd [#allocation4], 4294967040 }
 0x221   :  { %211 = vsyncpa [#allocation3], 1 }
 0x222   :  { %212 = vsyncpa [#allocation6], 1 }
 0x223   :  { %213 = vsyncpa [#allocation4], 1 }

</bundles_post_ra>
